<compile_context>
chip_gen: v7x
topology: tpu7x:2x2x1
jax: 0.10.0
libtpu: 0.0.40
codegen_flags: <defaults>
</compile_context>

<pallas_src>
import numpy as np
import jax
import jax.numpy as jnp
from jax.experimental import pallas as pl

NC = 1                 # nc
NDF = 8                # int(opt.ndf)
PATH_LENGTH = 10       # Path_length  (out channels of final conv)
KERNELS = [4, 4, 4]    # layer l uses KERNELS[L-1-l]
STRIDES = [1, 2, 2]
PADS = [0, 1, 1]
BN_EPS = 1e-5
LRELU_SLOPE = 0.2


# --------------------------- in-kernel helpers ---------------------------

def _bn_lrelu(y, gamma, beta):
    """Training-mode BatchNorm on a transposed [C, M] slab: biased variance
    over the lane (M) axis, folded into per-channel (sublane) scale/shift,
    then LeakyReLU(0.2) via max(a, slope*a).  All in f32."""
    inv_m = 1.0 / y.shape[1]
    mean = jnp.sum(y, axis=1, keepdims=True) * inv_m          # [C, 1]
    mean_sq = jnp.sum(y * y, axis=1, keepdims=True) * inv_m
    var = jnp.maximum(mean_sq - mean * mean, 0.0)
    scale = gamma * jax.lax.rsqrt(var + BN_EPS)               # hoisted once
    shift = beta - mean * scale
    a = y * scale + shift
    return jnp.maximum(a, LRELU_SLOPE * a)


def _make_fused_kernel(plan):
    """Whole-network kernel.  Ref order:
         patches0 (bf16 [K0, M0]), wslab (bf16), bnslab (f32),
         sel_l (bf16) for every layer >= 1, out (f32 [OC_last, M_last])."""
    n_sel = sum(1 for lp in plan if not lp["is_first"])

    def kernel(*refs):
        patches_ref, wslab_ref, bnslab_ref = refs[0], refs[1], refs[2]
        sel_refs = refs[3:3 + n_sel]
        out_ref = refs[3 + n_sel]

        wslab = wslab_ref[...]          # [WR, WC] bf16 — single load, sliced below
        bnslab = bnslab_ref[...]        # [BR, 2]  f32

        act_bf = None
        sel_i = 0
        for lp in plan:
            oc, kdim, r0 = lp["oc"], lp["kdim"], lp["w_row"]
            w = wslab[r0:r0 + oc, 0:kdim]                      # [OC, K] bf16
            if lp["is_first"]:
                rhs = patches_ref[...]                         # [K0, M0] bf16
            else:
                c, kk, m = lp["c"], lp["kk"], lp["m"]
                sel = sel_refs[sel_i][...]                     # [R, kk*M] bf16
                sel_i += 1
                # in-VMEM im2col (transposed): channels on sublanes, output
                # positions on lanes -> ONE dense gather matmul.
                xall = jnp.dot(act_bf, sel,
                               preferred_element_type=jnp.float32)   # [C, kk*M]
                # restage per-offset blocks to offset-major K, then a single
                # concatenated-K conv matmul (no 16-deep add chain).
                rhs = jnp.concatenate(
                    [xall[:, o * m:(o + 1) * m] for o in range(kk)],
                    axis=0).astype(jnp.bfloat16)               # [kk*C, M]
            y = jnp.dot(w, rhs, preferred_element_type=jnp.float32)  # [OC, M]
            if lp["is_last"]:
                out_ref[...] = jax.nn.sigmoid(y)
            else:
                b0 = lp["bn_row"]
                gamma = bnslab[b0:b0 + oc, 0:1]                # [OC, 1]
                beta = bnslab[b0:b0 + oc, 1:2]
                act_bf = _bn_lrelu(y, gamma, beta).astype(jnp.bfloat16)

    return kernel


# ------------------------------ host glue ---------------------------------

def _im2col_T(x, kh, kw, stride, pad):
    """x: [N, C, H, W] -> transposed patches [C*KH*KW, N*OH*OW].
    Row order matches w.reshape(OC, C*KH*KW); columns are (n, oh, ow)."""
    x = jnp.pad(x, ((0, 0), (0, 0), (pad, pad), (pad, pad)))
    n, c, h, w = x.shape
    oh = (h - kh) // stride + 1
    ow = (w - kw) // stride + 1
    pieces = []
    for i in range(kh):
        for j in range(kw):
            pieces.append(x[:, :, i:i + stride * oh:stride, j:j + stride * ow:stride])
    p = jnp.stack(pieces, axis=2)                  # [N, C, KH*KW, OH, OW]
    p = p.transpose(1, 2, 0, 3, 4)                 # [C, KH*KW, N, OH, OW]
    return p.reshape(c * kh * kw, n * oh * ow)


def _make_selection_T(n, in_h, in_w, k, stride, pad):
    """Constant transposed gather matrix: S[r, o*M + m] = 1 picks input row
    r = (n, hh, ww) (lane index of the previous act^T slab) for kernel offset
    o = i*k + j and output position m = (n, oh, ow).  All-zero columns encode
    spatial padding."""
    oh = (in_h + 2 * pad - k) // stride + 1
    ow = (in_w + 2 * pad - k) // stride + 1
    m = n * oh * ow
    sel = np.zeros((n * in_h * in_w, k * k * m), np.float32)
    for i in range(k):
        for j in range(k):
            o = i * k + j
            for nn in range(n):
                for yy in range(oh):
                    hh = stride * yy + i - pad
                    if hh < 0 or hh >= in_h:
                        continue
                    for xx in range(ow):
                        ww = stride * xx + j - pad
                        if ww < 0 or ww >= in_w:
                            continue
                        mm = nn * oh * ow + yy * ow + xx
                        sel[nn * in_h * in_w + hh * in_w + ww, o * m + mm] = 1.0
    return sel


def init_params(key):
    """DCGAN-style N(0, 0.02) conv weights; BN gamma=1, beta=0 defaults."""
    layer_len = len(KERNELS)
    params = []
    in_ch, out_ch = NC, NDF
    for lp in range(layer_len):
        if lp > 0:
            in_ch = out_ch
            out_ch = in_ch * 2
        k = KERNELS[layer_len - lp - 1]
        oc = PATH_LENGTH if lp == layer_len - 1 else out_ch
        key, sub = jax.random.split(key)
        layer = {"w": jax.random.normal(sub, (oc, in_ch, k, k), jnp.float32) * 0.02}
        if lp != layer_len - 1:
            layer["gamma"] = jnp.ones((oc,), jnp.float32)
            layer["beta"] = jnp.zeros((oc,), jnp.float32)
        params.append(layer)
    return params


def netD_8_forward(params, x):
    """x: [N, NC, H, W] float32 (NCHW) -> [N, PATH_LENGTH, OH, OW].
    Training-mode BN (batch statistics), like the PyTorch module in train()."""
    layer_len = len(params)
    n, _, cur_h, cur_w = x.shape
    plan, sels, wmats, bns = [], [], [], []
    w_row = bn_row = 0
    max_kdim = 0
    flops = 0
    prev_m = None
    patches0 = None
    for li, layer in enumerate(params):
        w = layer["w"]
        oc, ic, k = w.shape[0], w.shape[1], w.shape[2]
        s_ = STRIDES[layer_len - li - 1]
        p_ = PADS[layer_len - li - 1]
        oh = (cur_h + 2 * p_ - k) // s_ + 1
        ow = (cur_w + 2 * p_ - k) // s_ + 1
        m = n * oh * ow
        kdim = ic * k * k
        is_first = li == 0
        is_last = li == layer_len - 1
        if is_first:
            # layer-0 im2col stays tiny host-side preprocessing (a layer-0
            # selection constant would cost far more DMA than the kernel).
            patches0 = _im2col_T(x, k, k, s_, p_).astype(jnp.bfloat16)
            wmat = w.reshape(oc, kdim)                                 # [OC, C*k*k]
            flops += 2 * oc * kdim * m
        else:
            sels.append(jnp.asarray(_make_selection_T(n, cur_h, cur_w, k, s_, p_),
                                    dtype=jnp.bfloat16))
            wmat = jnp.transpose(w, (0, 2, 3, 1)).reshape(oc, kdim)    # offset-major
            flops += 2 * ic * prev_m * (k * k * m) + 2 * oc * kdim * m
        lp = {"is_first": is_first, "is_last": is_last, "m": m, "c": ic,
              "oc": oc, "kk": k * k, "kdim": kdim, "w_row": w_row}
        wmats.append((w_row, wmat))
        oc_pad = -(-oc // 8) * 8
        w_row += oc_pad
        if not is_last:
            lp["bn_row"] = bn_row
            bns.append((bn_row, layer["gamma"], layer["beta"]))
            bn_row += oc_pad
        max_kdim = max(max_kdim, kdim)
        plan.append(lp)
        prev_m = m
        cur_h, cur_w = oh, ow

    # one padded bf16 slab for all conv weights (single prologue DMA instead of
    # one tiny DMA per weight); row blocks are sublane-aligned (multiples of 8).
    wslab = jnp.zeros((w_row, max_kdim), jnp.bfloat16)
    for r0, wmat in wmats:
        wslab = wslab.at[r0:r0 + wmat.shape[0], :wmat.shape[1]].set(
            wmat.astype(jnp.bfloat16))
    # one f32 slab for all BatchNorm affine params (col 0 = gamma, col 1 = beta)
    bnslab = jnp.zeros((max(bn_row, 8), 2), jnp.float32)
    for r0, gamma, beta in bns:
        gb = jnp.stack([gamma.reshape(-1), beta.reshape(-1)], axis=1)
        bnslab = bnslab.at[r0:r0 + gb.shape[0], :].set(gb)

    operands = [patches0, wslab, bnslab] + sels
    out_oc, out_m = plan[-1]["oc"], plan[-1]["m"]
    bytes_accessed = sum(int(np.prod(op.shape)) * op.dtype.itemsize
                         for op in operands) + out_oc * out_m * 4
    transcendentals = sum(lp["oc"] for lp in plan if not lp["is_last"]) + out_oc * out_m

    y = pl.pallas_call(
        _make_fused_kernel(plan),
        out_shape=jax.ShapeDtypeStruct((out_oc, out_m), jnp.float32),
        cost_estimate=pl.CostEstimate(flops=int(flops),
                                      transcendentals=int(transcendentals),
                                      bytes_accessed=int(bytes_accessed)),
    )(*operands)
    # single final layout conversion back to NCHW (PyTorch output layout)
    return y.reshape(out_oc, n, cur_h, cur_w).transpose(1, 0, 2, 3)


if __name__ == "__main__":
    key = jax.random.PRNGKey(0)
    pkey, xkey = jax.random.split(key)
    params = init_params(pkey)
    # small input consistent with the module: batch=2, nc=1, 16x16 spatial
    x = jax.random.normal(xkey, (2, NC, 16, 16), jnp.float32)
    fwd = jax.jit(netD_8_forward)
    out = jax.block_until_ready(fwd(params, x))
    assert out.shape == (2, PATH_LENGTH, 1, 1), out.shape
    assert bool(jnp.all(jnp.isfinite(out))), "non-finite output"
    assert bool(jnp.all((out >= 0.0) & (out <= 1.0))), "sigmoid range violated"
    # TODO(synk): eval-mode BatchNorm (running statistics) not implemented;
    # forward matches the module's default train() behaviour.
    print("KERNEL_OK")
</pallas_src>

<mosaic_0001>
module attributes {stable_mosaic.version = 11 : i64} {
  func.func @kernel(%arg0: memref<16x128xbf16, #tpu.memory_space<vmem>>, %arg1: memref<40x256xbf16, #tpu.memory_space<vmem>>, %arg2: memref<24x2xf32, #tpu.memory_space<vmem>>, %arg3: memref<128x512xbf16, #tpu.memory_space<vmem>>, %arg4: memref<32x32xbf16, #tpu.memory_space<vmem>>, %arg5: memref<10x2xf32, #tpu.memory_space<vmem>>) attributes {dimension_semantics = [], scalar_prefetch = 0 : i64, scratch_operands = 0 : i64, tpu.core_type = #tpu.core_type<tc>} {
    %c0 = arith.constant 0 : index
    %c0_0 = arith.constant 0 : index
    %0 = vector.load %arg1[%c0, %c0_0] : memref<40x256xbf16, #tpu.memory_space<vmem>>, vector<40x256xbf16>
    %c0_1 = arith.constant 0 : index
    %c0_2 = arith.constant 0 : index
    %1 = vector.load %arg2[%c0_1, %c0_2] : memref<24x2xf32, #tpu.memory_space<vmem>>, vector<24x2xf32>
    %2 = vector.extract_strided_slice %0 {offsets = [0, 0], sizes = [8, 16], strides = [1, 1]} : vector<40x256xbf16> to vector<8x16xbf16>
    %c0_3 = arith.constant 0 : index
    %c0_4 = arith.constant 0 : index
    %3 = vector.load %arg0[%c0_3, %c0_4] : memref<16x128xbf16, #tpu.memory_space<vmem>>, vector<16x128xbf16>
    %cst = arith.constant dense<0.000000e+00> : vector<8x128xf32>
    %4 = tpu.matmul %2, %3, %cst {dimension_numbers = #tpu.dot_dimension_numbers<[1], [0], [0], [1], [0, 0, 1, 1], [], []>} : vector<8x16xbf16>, vector<16x128xbf16>, vector<8x128xf32> -> vector<8x128xf32>
    %5 = vector.extract_strided_slice %1 {offsets = [0, 0], sizes = [8, 1], strides = [1, 1]} : vector<24x2xf32> to vector<8x1xf32>
    %6 = vector.extract_strided_slice %1 {offsets = [0, 1], sizes = [8, 1], strides = [1, 1]} : vector<24x2xf32> to vector<8x1xf32>
    %cst_5 = arith.constant dense<0.000000e+00> : vector<8xf32>
    %7 = vector.multi_reduction <add>, %4, %cst_5 [1] : vector<8x128xf32> to vector<8xf32>
    %8 = vector.shape_cast %7 : vector<8xf32> to vector<8x1xf32>
    %cst_6 = arith.constant 7.812500e-03 : f32
    %9 = vector.broadcast %cst_6 : f32 to vector<8x1xf32>
    %10 = arith.mulf %8, %9 : vector<8x1xf32>
    %11 = arith.mulf %4, %4 : vector<8x128xf32>
    %cst_7 = arith.constant dense<0.000000e+00> : vector<8xf32>
    %12 = vector.multi_reduction <add>, %11, %cst_7 [1] : vector<8x128xf32> to vector<8xf32>
    %13 = vector.shape_cast %12 : vector<8xf32> to vector<8x1xf32>
    %cst_8 = arith.constant 7.812500e-03 : f32
    %14 = vector.broadcast %cst_8 : f32 to vector<8x1xf32>
    %15 = arith.mulf %13, %14 : vector<8x1xf32>
    %16 = arith.mulf %10, %10 : vector<8x1xf32>
    %17 = arith.subf %15, %16 : vector<8x1xf32>
    %cst_9 = arith.constant 0.000000e+00 : f32
    %18 = vector.broadcast %cst_9 : f32 to vector<8x1xf32>
    %19 = arith.maximumf %17, %18 : vector<8x1xf32>
    %cst_10 = arith.constant 9.99999974E-6 : f32
    %20 = vector.broadcast %cst_10 : f32 to vector<8x1xf32>
    %21 = arith.addf %19, %20 : vector<8x1xf32>
    %22 = math.rsqrt %21 : vector<8x1xf32>
    %23 = arith.mulf %5, %22 : vector<8x1xf32>
    %24 = arith.mulf %10, %23 : vector<8x1xf32>
    %25 = arith.subf %6, %24 : vector<8x1xf32>
    %26 = vector.broadcast %23 : vector<8x1xf32> to vector<8x128xf32>
    %27 = arith.mulf %4, %26 : vector<8x128xf32>
    %28 = vector.broadcast %25 : vector<8x1xf32> to vector<8x128xf32>
    %29 = arith.addf %27, %28 : vector<8x128xf32>
    %cst_11 = arith.constant 2.000000e-01 : f32
    %30 = vector.broadcast %cst_11 : f32 to vector<8x128xf32>
    %31 = arith.mulf %30, %29 : vector<8x128xf32>
    %32 = arith.maximumf %29, %31 : vector<8x128xf32>
    %33 = arith.truncf %32 : vector<8x128xf32> to vector<8x128xbf16>
    %34 = vector.extract_strided_slice %0 {offsets = [8, 0], sizes = [16, 128], strides = [1, 1]} : vector<40x256xbf16> to vector<16x128xbf16>
    %c0_12 = arith.constant 0 : index
    %c0_13 = arith.constant 0 : index
    %35 = vector.load %arg3[%c0_12, %c0_13] : memref<128x512xbf16, #tpu.memory_space<vmem>>, vector<128x512xbf16>
    %cst_14 = arith.constant dense<0.000000e+00> : vector<8x512xf32>
    %36 = tpu.matmul %33, %35, %cst_14 {dimension_numbers = #tpu.dot_dimension_numbers<[1], [0], [0], [1], [0, 0, 1, 1], [], []>} : vector<8x128xbf16>, vector<128x512xbf16>, vector<8x512xf32> -> vector<8x512xf32>
    %37 = vector.extract_strided_slice %36 {offsets = [0, 0], sizes = [8, 32], strides = [1, 1]} : vector<8x512xf32> to vector<8x32xf32>
    %38 = vector.extract_strided_slice %36 {offsets = [0, 32], sizes = [8, 32], strides = [1, 1]} : vector<8x512xf32> to vector<8x32xf32>
    %39 = vector.extract_strided_slice %36 {offsets = [0, 64], sizes = [8, 32], strides = [1, 1]} : vector<8x512xf32> to vector<8x32xf32>
    %40 = vector.extract_strided_slice %36 {offsets = [0, 96], sizes = [8, 32], strides = [1, 1]} : vector<8x512xf32> to vector<8x32xf32>
    %41 = vector.extract_strided_slice %36 {offsets = [0, 128], sizes = [8, 32], strides = [1, 1]} : vector<8x512xf32> to vector<8x32xf32>
    %42 = vector.extract_strided_slice %36 {offsets = [0, 160], sizes = [8, 32], strides = [1, 1]} : vector<8x512xf32> to vector<8x32xf32>
    %43 = vector.extract_strided_slice %36 {offsets = [0, 192], sizes = [8, 32], strides = [1, 1]} : vector<8x512xf32> to vector<8x32xf32>
    %44 = vector.extract_strided_slice %36 {offsets = [0, 224], sizes = [8, 32], strides = [1, 1]} : vector<8x512xf32> to vector<8x32xf32>
    %45 = vector.extract_strided_slice %36 {offsets = [0, 256], sizes = [8, 32], strides = [1, 1]} : vector<8x512xf32> to vector<8x32xf32>
    %46 = vector.extract_strided_slice %36 {offsets = [0, 288], sizes = [8, 32], strides = [1, 1]} : vector<8x512xf32> to vector<8x32xf32>
    %47 = vector.extract_strided_slice %36 {offsets = [0, 320], sizes = [8, 32], strides = [1, 1]} : vector<8x512xf32> to vector<8x32xf32>
    %48 = vector.extract_strided_slice %36 {offsets = [0, 352], sizes = [8, 32], strides = [1, 1]} : vector<8x512xf32> to vector<8x32xf32>
    %49 = vector.extract_strided_slice %36 {offsets = [0, 384], sizes = [8, 32], strides = [1, 1]} : vector<8x512xf32> to vector<8x32xf32>
    %50 = vector.extract_strided_slice %36 {offsets = [0, 416], sizes = [8, 32], strides = [1, 1]} : vector<8x512xf32> to vector<8x32xf32>
    %51 = vector.extract_strided_slice %36 {offsets = [0, 448], sizes = [8, 32], strides = [1, 1]} : vector<8x512xf32> to vector<8x32xf32>
    %52 = vector.extract_strided_slice %36 {offsets = [0, 480], sizes = [8, 32], strides = [1, 1]} : vector<8x512xf32> to vector<8x32xf32>
    %53 = tpu.concatenate %37, %38, %39, %40, %41, %42, %43, %44, %45, %46, %47, %48, %49, %50, %51, %52 in 0 : vector<8x32xf32>, vector<8x32xf32>, vector<8x32xf32>, vector<8x32xf32>, vector<8x32xf32>, vector<8x32xf32>, vector<8x32xf32>, vector<8x32xf32>, vector<8x32xf32>, vector<8x32xf32>, vector<8x32xf32>, vector<8x32xf32>, vector<8x32xf32>, vector<8x32xf32>, vector<8x32xf32>, vector<8x32xf32> -> vector<128x32xf32>
    %54 = arith.truncf %53 : vector<128x32xf32> to vector<128x32xbf16>
    %cst_15 = arith.constant dense<0.000000e+00> : vector<16x32xf32>
    %55 = tpu.matmul %34, %54, %cst_15 {dimension_numbers = #tpu.dot_dimension_numbers<[1], [0], [0], [1], [0, 0, 1, 1], [], []>} : vector<16x128xbf16>, vector<128x32xbf16>, vector<16x32xf32> -> vector<16x32xf32>
    %56 = vector.extract_strided_slice %1 {offsets = [8, 0], sizes = [16, 1], strides = [1, 1]} : vector<24x2xf32> to vector<16x1xf32>
    %57 = vector.extract_strided_slice %1 {offsets = [8, 1], sizes = [16, 1], strides = [1, 1]} : vector<24x2xf32> to vector<16x1xf32>
    %cst_16 = arith.constant dense<0.000000e+00> : vector<16xf32>
    %58 = vector.multi_reduction <add>, %55, %cst_16 [1] : vector<16x32xf32> to vector<16xf32>
    %59 = vector.shape_cast %58 : vector<16xf32> to vector<16x1xf32>
    %cst_17 = arith.constant 3.125000e-02 : f32
    %60 = vector.broadcast %cst_17 : f32 to vector<16x1xf32>
    %61 = arith.mulf %59, %60 : vector<16x1xf32>
    %62 = arith.mulf %55, %55 : vector<16x32xf32>
    %cst_18 = arith.constant dense<0.000000e+00> : vector<16xf32>
    %63 = vector.multi_reduction <add>, %62, %cst_18 [1] : vector<16x32xf32> to vector<16xf32>
    %64 = vector.shape_cast %63 : vector<16xf32> to vector<16x1xf32>
    %cst_19 = arith.constant 3.125000e-02 : f32
    %65 = vector.broadcast %cst_19 : f32 to vector<16x1xf32>
    %66 = arith.mulf %64, %65 : vector<16x1xf32>
    %67 = arith.mulf %61, %61 : vector<16x1xf32>
    %68 = arith.subf %66, %67 : vector<16x1xf32>
    %cst_20 = arith.constant 0.000000e+00 : f32
    %69 = vector.broadcast %cst_20 : f32 to vector<16x1xf32>
    %70 = arith.maximumf %68, %69 : vector<16x1xf32>
    %cst_21 = arith.constant 9.99999974E-6 : f32
    %71 = vector.broadcast %cst_21 : f32 to vector<16x1xf32>
    %72 = arith.addf %70, %71 : vector<16x1xf32>
    %73 = math.rsqrt %72 : vector<16x1xf32>
    %74 = arith.mulf %56, %73 : vector<16x1xf32>
    %75 = arith.mulf %61, %74 : vector<16x1xf32>
    %76 = arith.subf %57, %75 : vector<16x1xf32>
    %77 = vector.broadcast %74 : vector<16x1xf32> to vector<16x32xf32>
    %78 = arith.mulf %55, %77 : vector<16x32xf32>
    %79 = vector.broadcast %76 : vector<16x1xf32> to vector<16x32xf32>
    %80 = arith.addf %78, %79 : vector<16x32xf32>
    %cst_22 = arith.constant 2.000000e-01 : f32
    %81 = vector.broadcast %cst_22 : f32 to vector<16x32xf32>
    %82 = arith.mulf %81, %80 : vector<16x32xf32>
    %83 = arith.maximumf %80, %82 : vector<16x32xf32>
    %84 = arith.truncf %83 : vector<16x32xf32> to vector<16x32xbf16>
    %85 = vector.extract_strided_slice %0 {offsets = [24, 0], sizes = [10, 256], strides = [1, 1]} : vector<40x256xbf16> to vector<10x256xbf16>
    %c0_23 = arith.constant 0 : index
    %c0_24 = arith.constant 0 : index
    %86 = vector.load %arg4[%c0_23, %c0_24] : memref<32x32xbf16, #tpu.memory_space<vmem>>, vector<32x32xbf16>
    %cst_25 = arith.constant dense<0.000000e+00> : vector<16x32xf32>
    %87 = tpu.matmul %84, %86, %cst_25 {dimension_numbers = #tpu.dot_dimension_numbers<[1], [0], [0], [1], [0, 0, 1, 1], [], []>} : vector<16x32xbf16>, vector<32x32xbf16>, vector<16x32xf32> -> vector<16x32xf32>
    %88 = vector.extract_strided_slice %87 {offsets = [0, 0], sizes = [16, 2], strides = [1, 1]} : vector<16x32xf32> to vector<16x2xf32>
    %89 = vector.extract_strided_slice %87 {offsets = [0, 2], sizes = [16, 2], strides = [1, 1]} : vector<16x32xf32> to vector<16x2xf32>
    %90 = vector.extract_strided_slice %87 {offsets = [0, 4], sizes = [16, 2], strides = [1, 1]} : vector<16x32xf32> to vector<16x2xf32>
    %91 = vector.extract_strided_slice %87 {offsets = [0, 6], sizes = [16, 2], strides = [1, 1]} : vector<16x32xf32> to vector<16x2xf32>
    %92 = vector.extract_strided_slice %87 {offsets = [0, 8], sizes = [16, 2], strides = [1, 1]} : vector<16x32xf32> to vector<16x2xf32>
    %93 = vector.extract_strided_slice %87 {offsets = [0, 10], sizes = [16, 2], strides = [1, 1]} : vector<16x32xf32> to vector<16x2xf32>
    %94 = vector.extract_strided_slice %87 {offsets = [0, 12], sizes = [16, 2], strides = [1, 1]} : vector<16x32xf32> to vector<16x2xf32>
    %95 = vector.extract_strided_slice %87 {offsets = [0, 14], sizes = [16, 2], strides = [1, 1]} : vector<16x32xf32> to vector<16x2xf32>
    %96 = vector.extract_strided_slice %87 {offsets = [0, 16], sizes = [16, 2], strides = [1, 1]} : vector<16x32xf32> to vector<16x2xf32>
    %97 = vector.extract_strided_slice %87 {offsets = [0, 18], sizes = [16, 2], strides = [1, 1]} : vector<16x32xf32> to vector<16x2xf32>
    %98 = vector.extract_strided_slice %87 {offsets = [0, 20], sizes = [16, 2], strides = [1, 1]} : vector<16x32xf32> to vector<16x2xf32>
    %99 = vector.extract_strided_slice %87 {offsets = [0, 22], sizes = [16, 2], strides = [1, 1]} : vector<16x32xf32> to vector<16x2xf32>
    %100 = vector.extract_strided_slice %87 {offsets = [0, 24], sizes = [16, 2], strides = [1, 1]} : vector<16x32xf32> to vector<16x2xf32>
    %101 = vector.extract_strided_slice %87 {offsets = [0, 26], sizes = [16, 2], strides = [1, 1]} : vector<16x32xf32> to vector<16x2xf32>
    %102 = vector.extract_strided_slice %87 {offsets = [0, 28], sizes = [16, 2], strides = [1, 1]} : vector<16x32xf32> to vector<16x2xf32>
    %103 = vector.extract_strided_slice %87 {offsets = [0, 30], sizes = [16, 2], strides = [1, 1]} : vector<16x32xf32> to vector<16x2xf32>
    %104 = tpu.concatenate %88, %89, %90, %91, %92, %93, %94, %95, %96, %97, %98, %99, %100, %101, %102, %103 in 0 : vector<16x2xf32>, vector<16x2xf32>, vector<16x2xf32>, vector<16x2xf32>, vector<16x2xf32>, vector<16x2xf32>, vector<16x2xf32>, vector<16x2xf32>, vector<16x2xf32>, vector<16x2xf32>, vector<16x2xf32>, vector<16x2xf32>, vector<16x2xf32>, vector<16x2xf32>, vector<16x2xf32>, vector<16x2xf32> -> vector<256x2xf32>
    %105 = arith.truncf %104 : vector<256x2xf32> to vector<256x2xbf16>
    %cst_26 = arith.constant dense<0.000000e+00> : vector<10x2xf32>
    %106 = tpu.matmul %85, %105, %cst_26 {dimension_numbers = #tpu.dot_dimension_numbers<[1], [0], [0], [1], [0, 0, 1, 1], [], []>} : vector<10x256xbf16>, vector<256x2xbf16>, vector<10x2xf32> -> vector<10x2xf32>
    %107 = arith.negf %106 : vector<10x2xf32>
    %108 = math.exp %107 : vector<10x2xf32>
    %cst_27 = arith.constant 1.000000e+00 : f32
    %109 = vector.broadcast %cst_27 : f32 to vector<10x2xf32>
    %110 = arith.addf %109, %108 : vector<10x2xf32>
    %111 = arith.divf %109, %110 : vector<10x2xf32>
    %c0_28 = arith.constant 0 : index
    %c0_29 = arith.constant 0 : index
    %112 = vector.load %arg5[%c0_28, %c0_29] : memref<10x2xf32, #tpu.memory_space<vmem>>, vector<10x2xf32>
    tpu.vector_store %arg5[%c0_28, %c0_29], %111 {strides = array<i32>} : memref<10x2xf32, #tpu.memory_space<vmem>>, vector<10x2xf32>,
    return
  }
}

</mosaic_0001>

<bundles_post_ra>
// kernel: netD_8_forward.1
= control target key start
LH: loop header
LB: loop body
LE: loop exit
PB: predicated region body
PF: predicated region fallthrough
CT: control target
= control target key end

     0   :  { %v1079_v0 = vmov 0.0   ;;  %vm1080_vm0 = vmmov 0   ;;  %vm37_vm1 = vcmask 130048   ;;  %v1081_v8 = vmov 0   ;;  %s1083_s23 = smov 1   ;;  %s1085_s13 = smov 32   ;;  %s1302_s0 = inlined_call_operand.vmem [shape: bf16[16,128], index: 0, kind: input, shape index: {}]   ;;  %s1303_s1 = inlined_call_operand.vmem [shape: bf16[40,256], index: 1, kind: input, shape index: {}]   ;;  %s1304_s2 = inlined_call_operand.vmem [shape: f32[24,2], index: 2, kind: input, shape index: {}]   ;;  %s1305_s3 = inlined_call_operand.vmem [shape: bf16[128,512], index: 3, kind: input, shape index: {}]   ;;  %s1306_s4 = inlined_call_operand.vmem [shape: bf16[32,32], index: 4, kind: input, shape index: {}]   ;;  %s1307_s5 = inlined_call_operand.vmem [shape: f32[10,2], index: 5, kind: output, shape index: {}]  }
   0x1   :  { %873 = vmatprep.subr.bf16.mxu1 %v1079_v0  ;;  %v1010_v1 = vld [vmem:[%s1302_s0] sm:$0xff]   ;;  %875 = vmatprep.mubr.msk.bf16.mxu1 %vm1080_vm0, %v1079_v0  ;;  %v1082_v17 = vmov 1   ;;  %v1014_v24 = vld [vmem:[%s1305_s3 + $0xc] ss:$16 sps:$4 sm:$0xff]   ;;  %v1016_v25 = vld [vmem:[%s1305_s3 + $0x8] ss:$16 sps:$4 sm:$0xff]  }
   0x2   :  { %874 = vmatpush3.bf16.msra.mxu1 %v1010_v1  ;;  %v21_v2 = vld [vmem:[%s1303_s1] sm:$0xff]  ;;  %930 = vset.pattern.permute.xlu1 %v1081_v8  ;;  %v1020_v28 = vld [vmem:[%s1305_s3 + $0x2c] ss:$16 sps:$4 sm:$0xff]   ;;  %v1022_v29 = vld [vmem:[%s1305_s3 + $0x28] ss:$16 sps:$4 sm:$0xff]   ;;  %s1086_s14 = smov 64  }
   0x3   :  { %380 = vmatprep.mubr.bf16.mxu0 %v1081_v8  ;;  %931 = vset.pattern.permute.xlu0 %v1082_v17  ;;  %v26_v18 = vld [vmem:[%s1304_s2] sm:$0xff]  ;;  %v1026_v32 = vld [vmem:[%s1305_s3 + $0x4c] ss:$16 sps:$4 sm:$0xff]   ;;  %v1028_v33 = vld [vmem:[%s1305_s3 + $0x48] ss:$16 sps:$4 sm:$0xff]   ;;  %vm484_vm2 = vcmask 261120  }
   0x4   :  { %v1011_v22 = vld [vmem:[%s1305_s3] ss:$16 sps:$4 sm:$0xff]   ;;  %v1013_v23 = vld [vmem:[%s1305_s3 + $0x4] ss:$16 sps:$4 sm:$0xff]   ;;  %348 = vmatprep.subr.bf16.mxu0 %v1014_v24  ;;  %v1032_v35 = vld [vmem:[%s1305_s3 + $0x6c] ss:$16 sps:$4 sm:$0xff]  }
   0x5   :  { %876 = vmatmul.mubr.msk.bf16.vlgmr.msra.gmra.mrb[0].mxu1 %vm37_vm1, %v21_v2  ;;  %307 = vmatprep.subr.bf16.mxu1 %v1013_v23  ;;  %v1017_v26 = vld [vmem:[%s1305_s3 + $0x20] ss:$16 sps:$4 sm:$0xff]   ;;  %v1019_v27 = vld [vmem:[%s1305_s3 + $0x24] ss:$16 sps:$4 sm:$0xff]   ;;  %v1034_v37 = vld [vmem:[%s1305_s3 + $0x68] ss:$16 sps:$4 sm:$0xff]  }
   0x6   :  { %339 = vmatprep.mubr.bf16.mxu1 %v1081_v8  ;;  %308 = vmatpush1.bf16.msra.mxu1 %v1011_v22  ;;  %v1025_v30 = vld [vmem:[%s1305_s3 + $0x44] ss:$16 sps:$4 sm:$0xff]   ;;  %v1023_v31 = vld [vmem:[%s1305_s3 + $0x40] ss:$16 sps:$4 sm:$0xff]   ;;  %v1038_v40 = vld [vmem:[%s1305_s3 + $0x8c] ss:$16 sps:$4 sm:$0xff]  }
   0x7   :  { %349 = vmatpush1.bf16.msra.mxu0 %v1016_v25  ;;  %309 = vmatprep.subr.bf16.mxu1 %v1019_v27  ;;  %v1031_v34 = vld [vmem:[%s1305_s3 + $0x64] ss:$16 sps:$4 sm:$0xff]   ;;  %v1029_v36 = vld [vmem:[%s1305_s3 + $0x60] ss:$16 sps:$4 sm:$0xff]   ;;  %v1040_v41 = vld [vmem:[%s1305_s3 + $0x88] ss:$16 sps:$4 sm:$0xff]  }
   0x8   :  { %350 = vmatprep.subr.bf16.mxu0 %v1020_v28  ;;  %v1037_v38 = vld [vmem:[%s1305_s3 + $0x84] ss:$16 sps:$4 sm:$0xff]   ;;  %v1035_v39 = vld [vmem:[%s1305_s3 + $0x80] ss:$16 sps:$4 sm:$0xff]   ;;  %v1044_v43 = vld [vmem:[%s1305_s3 + $0xac] ss:$16 sps:$4 sm:$0xff]  }
   0x9   :  { %v1043_v42 = vld [vmem:[%s1305_s3 + $0xa4] ss:$16 sps:$4 sm:$0xff]   ;;  %v1041_v44 = vld [vmem:[%s1305_s3 + $0xa0] ss:$16 sps:$4 sm:$0xff]   ;;  %v1046_v45 = vld [vmem:[%s1305_s3 + $0xa8] ss:$16 sps:$4 sm:$0xff]  }
   0xa   :  { %310 = vmatpush1.bf16.msra.mxu1 %v1017_v26  ;;  %v1049_v48 = vld [vmem:[%s1305_s3 + $0xc4] ss:$16 sps:$4 sm:$0xff]   ;;  %v1050_v49 = vld [vmem:[%s1305_s3 + $0xcc] ss:$16 sps:$4 sm:$0xff]   ;;  %v1047_v50 = vld [vmem:[%s1305_s3 + $0xc0] ss:$16 sps:$4 sm:$0xff]  }
   0xb   :  { %351 = vmatpush1.bf16.msra.mxu0 %v1022_v29  ;;  %311 = vmatprep.subr.bf16.mxu1 %v1025_v30  ;;  %v1052_v51 = vld [vmem:[%s1305_s3 + $0xc8] ss:$16 sps:$4 sm:$0xff]   ;;  %v1055_v52 = vld [vmem:[%s1305_s3 + $0xe4] ss:$16 sps:$4 sm:$0xff]   ;;  %v1056_v53 = vld [vmem:[%s1305_s3 + $0xec] ss:$16 sps:$4 sm:$0xff]  }
   0xc   :  { %352 = vmatprep.subr.bf16.mxu0 %v1026_v32  ;;  %v1053_v54 = vld [vmem:[%s1305_s3 + $0xe0] ss:$16 sps:$4 sm:$0xff]   ;;  %v1058_v55 = vld [vmem:[%s1305_s3 + $0xe8] ss:$16 sps:$4 sm:$0xff]   ;;  %s1084_s3 = smov 96   ;;  %s1088_s22 = smov 112  }
   0xd   :  { %v1059_v29 = vld [vmem:[%s1303_s1 + $0x8] ss:$8 sps:$4 sm:$0xff]   ;;  %s1089_s24 = smov 108   ;;  %s1090_s25 = smov 126   ;;  %vm787_vm3 = vcmask 15360   ;;  %vm789_vm4 = vcmask 9216  }
   0xe   :  { %312 = vmatpush1.bf16.msra.mxu1 %v1023_v31  ;;  %s1091_s26 = smov 106   ;;  %s1092_s27 = smov 124  }
   0xf   :  { %353 = vmatpush1.bf16.msra.mxu0 %v1028_v33  ;;  %313 = vmatprep.subr.bf16.mxu1 %v1031_v34  ;;  %s1093_s28 = smov 104   ;;  %s1094_s29 = smov 122  }
  0x10   :  { %354 = vmatprep.subr.bf16.mxu0 %v1032_v35  ;;  %s1095_s30 = smov 102   ;;  %s1096_s6 = smov 120  }
  0x11   :  { %s1097_s7 = smov 100   ;;  %s1098_s8 = smov 118  }
  0x12   :  { %314 = vmatpush1.bf16.msra.mxu1 %v1029_v36  ;;  %s1099_s11 = smov 98   ;;  %s1100_s12 = smov 116  }
  0x13   :  { %355 = vmatpush1.bf16.msra.mxu0 %v1034_v37  ;;  %315 = vmatprep.subr.bf16.mxu1 %v1037_v38 }
  0x14   :  { %356 = vmatprep.subr.bf16.mxu0 %v1038_v40 }
  0x16   :  { %316 = vmatpush1.bf16.msra.mxu1 %v1035_v39 }
  0x17   :  { %357 = vmatpush1.bf16.msra.mxu0 %v1040_v41  ;;  %317 = vmatprep.subr.bf16.mxu1 %v1043_v42 }
  0x18   :  { %358 = vmatprep.subr.bf16.mxu0 %v1044_v43 }
  0x1a   :  { %318 = vmatpush1.bf16.msra.mxu1 %v1041_v44 }
  0x1b   :  { %359 = vmatpush1.bf16.msra.mxu0 %v1046_v45  ;;  %319 = vmatprep.subr.bf16.mxu1 %v1049_v48 }
  0x1c   :  { %360 = vmatprep.subr.bf16.mxu0 %v1050_v49 }
  0x1e   :  { %320 = vmatpush1.bf16.msra.mxu1 %v1047_v50 }
  0x1f   :  { %361 = vmatpush1.bf16.msra.mxu0 %v1052_v51  ;;  %321 = vmatprep.subr.bf16.mxu1 %v1055_v52 }
  0x20   :  { %362 = vmatprep.subr.bf16.mxu0 %v1056_v53 }
  0x22   :  { %322 = vmatpush1.bf16.msra.mxu1 %v1053_v54 }
  0x23   :  { %363 = vmatpush1.bf16.msra.mxu0 %v1058_v55  ;;  %879 = vmatprep.subr.bf16.mxu1 %v1079_v0 }
  0x24   :  { %899 = vmatprep.subr.bf16.mxu0 %v1079_v0 }
  0xd8   :  { %v1141_v3 = vpop.f32.mrb[0].mxu1 }
  0xd9   :  { %81 = vadd.xlane.f32.xlu0 %v1141_v3  ;;  %v877_v4 = vpop.f32.mrb[1].mxu1  ;;  %v84_v7 = vmul.f32 %v1141_v3, %v1141_v3 }
  0xda   :  { %v78_v5 = vpop.f32.mrb[2].mxu1 }
  0xdb   :  { %v878_v6 = vpop.f32.mrb[3].mxu1 }
  0xdd   :  { %85 = vadd.xlane.f32.xlu0 %v84_v7 }
 0x166   :  { %v82_v9 = vpop.xlane.xlu0 %81 }
 0x167   :  { %v83_v10 = vmul.f32 0.0078125, %v82_v9 }
 0x169   :  { %v88_v12 = vmul.f32 %v83_v10, %v83_v10 }
 0x16a   :  { %v86_v11 = vpop.xlane.xlu0 %85 }
 0x16b   :  { %v87_v13 = vmul.f32 0.0078125, %v86_v11 }
 0x16d   :  { %v89_v14 = vsub.f32 %v87_v13, %v88_v12 }
 0x16f   :  { %v90_v15 = vmax.f32 %v89_v14, 0.0 }
 0x171   :  { %v91_v16 = vadd.f32 1e-05, %v90_v15 }
 0x173   :  { %1065 = vrsqrt.f32 %v91_v16 }
 0x17d   :  { %v1066_v19 = vpop.eup %1065 }
 0x17e   :  { %v93_v20 = vmul.f32 %v1066_v19, %v26_v18 }
 0x180   :  { %v94_v21 = vmul.f32 %v93_v20, %v83_v10 }
 0x182   :  { %96 = vrot.lane.b32.xlu1 %v94_v21, %s1083_s23 }
 0x186   :  { %102 = vperm.xlu1 %930, %v93_v20  }
 0x1f4   :  { %v97_v46 = vpop.permute.xlu1 %96 }
 0x1f5   :  { %v99_v47 = vsub.f32 %v26_v18, %v97_v46 }
 0x1f7   :  { %108 = vperm.xlu0 %931, %v99_v47  }
 0x1fb   :  { %932 = vset.pattern.permute.xlu0 %v1081_v8 }
 0x205   :  { %v103_v56 = vpop.permute.xlu1 %102 }
 0x206   :  { %v105_v57 = vmul.f32 %v103_v56, %v1141_v3  ;;  %v28_v56 = vld [vmem:[%s1304_s2 + $0x10] sm:$0xff] }
 0x276   :  { %v109_v58 = vpop.permute.xlu0 %108 }
 0x277   :  { %v111_v59 = vadd.f32 %v109_v58, %v105_v57  ;;  %v27_v58 = vld [vmem:[%s1304_s2 + $0x8] sm:$0xff] }
 0x279   :  { %v112_v60 = vmul.f32 0.2, %v111_v59 }
 0x27b   :  { %v113_v61 = vmax.f32 %v111_v59, %v112_v60 }
 0x27d   :  { %v114_v62 = vpack.c.bf16 %v113_v61, %v113_v61 }
 0x27f   :  { %340 = vmatmul.mubr.bf16.vlgmr.msra.gmra.mrb[4].mxu1 %v114_v62  ;;  %381 = vmatmul.mubr.bf16.vlgmr.msra.gmra.mrb[0].mxu0 %v114_v62 }
 0x280   :  { %895 = vmatprep.mubr.msk.bf16.mxu1 %vm1080_vm0, %v1079_v0  ;;  %903 = vmatprep.mubr.msk.bf16.mxu0 %vm1080_vm0, %v1079_v0 }
 0x352   :  { %v341_v63 = vpop.f32.mrb[4].mxu1  ;;  %v382_v1 = vpop.f32.mrb[0].mxu0 }
 0x353   :  { %v384_v2 = vpop.f32.mrb[1].mxu0  ;;  %390 = vrot.lane.b32.xlu1 %v341_v63, %s1084_s3  ;;  %v343_v4 = vpop.f32.mrb[5].mxu1 }
 0x354   :  { %426 = vrot.lane.b32.xlu0 %v384_v2, %s1085_s13  ;;  %v345_v3 = vpop.f32.mrb[6].mxu1  ;;  %v386_v5 = vpop.f32.mrb[2].mxu0 }
 0x355   :  { %v346_v6 = vpop.f32.mrb[7].mxu1  ;;  %v387_v7 = vpop.f32.mrb[3].mxu0  ;;  %v1060_v5 = vld [vmem:[%s1306_s4] sm:$0xff]  }
 0x356   :  { %900 = vmatpush3.bf16.msra.mxu0 %v1060_v5  ;;  %v1061_v6 = vld [vmem:[%s1306_s4 + $0x8] sm:$0xff]   ;;  %s1087_s4 = smov 110  }
 0x357   :  { %393 = vrot.lane.b32.xlu1 %v341_v63, %s1086_s14  ;;  %901 = vmatprep.subr.bf16.mxu0 %v1079_v0 }
 0x35a   :  { %902 = vmatpush3.bf16.msra.mxu0 %v1061_v6 }
 0x35b   :  { %396 = vrot.lane.b32.xlu1 %v341_v63, %s1085_s13 }
 0x35f   :  { %410 = vrot.lane.b32.xlu1 %v382_v1, %s1084_s3 }
 0x363   :  { %400 = vrot.lane.b32.xlu1 %v343_v4, %s1084_s3 }
 0x367   :  { %403 = vrot.lane.b32.xlu1 %v343_v4, %s1086_s14 }
 0x36b   :  { %406 = vrot.lane.b32.xlu1 %v343_v4, %s1085_s13 }
 0x36f   :  { %413 = vrot.lane.b32.xlu1 %v382_v1, %s1086_s14 }
 0x373   :  { %416 = vrot.lane.b32.xlu1 %v382_v1, %s1085_s13 }
 0x377   :  { %420 = vrot.lane.b32.xlu1 %v384_v2, %s1084_s3  ;;  %s1101_s3 = smov 114  }
 0x37b   :  { %423 = vrot.lane.b32.xlu1 %v384_v2, %s1086_s14 }
 0x3c5   :  { %v391_v8 = vpop.permute.xlu1 %390 }
 0x3c6   :  { %v429_v9 = vpack.c.bf16 %v391_v8, %v341_v63  ;;  %v427_v26 = vpop.permute.xlu0 %426 }
 0x3c8   :  { %880 = vmatpush3.bf16.msra.mxu1 %v429_v9 }
 0x3c9   :  { %v394_v10 = vpop.permute.xlu1 %393  ;;  %881 = vmatprep.subr.bf16.mxu1 %v1079_v0 }
 0x3cd   :  { %v397_v11 = vpop.permute.xlu1 %396 }
 0x3ce   :  { %v430_v12 = vpack.c.bf16 %v397_v11, %v394_v10 }
 0x3d0   :  { %882 = vmatpush3.bf16.msra.mxu1 %v430_v12 }
 0x3d1   :  { %v411_v13 = vpop.permute.xlu1 %410  ;;  %883 = vmatprep.subr.bf16.mxu1 %v1079_v0 }
 0x3d2   :  { %v433_v21 = vpack.c.bf16 %v411_v13, %v382_v1 }
 0x3d5   :  { %v401_v14 = vpop.permute.xlu1 %400 }
 0x3d6   :  { %v431_v15 = vpack.c.bf16 %v401_v14, %v343_v4 }
 0x3d8   :  { %884 = vmatpush3.bf16.msra.mxu1 %v431_v15 }
 0x3d9   :  { %v404_v16 = vpop.permute.xlu1 %403  ;;  %885 = vmatprep.subr.bf16.mxu1 %v1079_v0 }
 0x3dd   :  { %v407_v18 = vpop.permute.xlu1 %406 }
 0x3de   :  { %v432_v19 = vpack.c.bf16 %v407_v18, %v404_v16 }
 0x3e0   :  { %886 = vmatpush3.bf16.msra.mxu1 %v432_v19 }
 0x3e1   :  { %v414_v20 = vpop.permute.xlu1 %413  ;;  %887 = vmatprep.subr.bf16.mxu1 %v1079_v0 }
 0x3e4   :  { %888 = vmatpush3.bf16.msra.mxu1 %v433_v21 }
 0x3e5   :  { %v417_v22 = vpop.permute.xlu1 %416  ;;  %889 = vmatprep.subr.bf16.mxu1 %v1079_v0 }
 0x3e6   :  { %v434_v23 = vpack.c.bf16 %v417_v22, %v414_v20 }
 0x3e8   :  { %890 = vmatpush3.bf16.msra.mxu1 %v434_v23 }
 0x3e9   :  { %v421_v24 = vpop.permute.xlu1 %420  ;;  %891 = vmatprep.subr.bf16.mxu1 %v1079_v0 }
 0x3ea   :  { %v435_v25 = vpack.c.bf16 %v421_v24, %v384_v2 }
 0x3ec   :  { %892 = vmatpush3.bf16.msra.mxu1 %v435_v25  ;;  %v1064_v25 = vld [vmem:[%s1303_s1 + $0x1c] ss:$8 sps:$4 sm:$0xff]  }
 0x3ed   :  { %v424_v27 = vpop.permute.xlu1 %423  ;;  %893 = vmatprep.subr.bf16.mxu1 %v1079_v0 }
 0x3ee   :  { %v436_v28 = vpack.c.bf16 %v427_v26, %v424_v27 }
 0x3f0   :  { %894 = vmatpush3.bf16.msra.mxu1 %v436_v28 }
 0x3f3   :  { %896 = vmatmul.mubr.bf16.vlgmr.msra.gmra.mrb[8].mxu1 %v1059_v29 }
 0x4c6   :  { %v477_v30 = vpop.f32.mrb[8].mxu1 }
 0x4c7   :  { %v897_v31 = vpop.f32.mrb[9].mxu1  ;;  %v485_v32 = vsel %vm484_vm2, %v477_v30, 0.0  ;;  %v493_v37 = vmul.f32 %v477_v30, %v477_v30 }
 0x4c8   :  { %486 = vadd.xlane.f32.xlu1 %v485_v32  ;;  %v480_v33 = vpop.f32.mrb[10].mxu1 }
 0x4c9   :  { %v898_v34 = vpop.f32.mrb[11].mxu1  ;;  %v488_v35 = vsel %vm484_vm2, %v480_v33, 0.0  ;;  %v494_v36 = vmul.f32 %v480_v33, %v480_v33  ;;  %v495_v39 = vsel %vm484_vm2, %v493_v37, 0.0 }
 0x4ca   :  { %489 = vadd.xlane.f32.xlu0 %v488_v35 }
 0x4cb   :  { %v498_v38 = vsel %vm484_vm2, %v494_v36, 0.0 }
 0x4cc   :  { %499 = vadd.xlane.f32.xlu1 %v498_v38 }
 0x4ce   :  { %496 = vadd.xlane.f32.xlu0 %v495_v39 }
 0x555   :  { %v487_v40 = vpop.xlane.xlu1 %486 }
 0x556   :  { %v491_v42 = vmul.f32 0.03125, %v487_v40 }
 0x557   :  { %v490_v41 = vpop.xlane.xlu0 %489 }
 0x558   :  { %v492_v43 = vmul.f32 0.03125, %v490_v41  ;;  %v503_v48 = vmul.f32 %v491_v42, %v491_v42 }
 0x559   :  { %v500_v44 = vpop.xlane.xlu1 %499 }
 0x55a   :  { %v504_v45 = vmul.f32 %v492_v43, %v492_v43  ;;  %v502_v46 = vmul.f32 0.03125, %v500_v44 }
 0x55b   :  { %v497_v47 = vpop.xlane.xlu0 %496 }
 0x55c   :  { %v506_v49 = vsub.f32 %v502_v46, %v504_v45  ;;  %v501_v50 = vmul.f32 0.03125, %v497_v47 }
 0x55e   :  { %v508_v51 = vmax.f32 %v506_v49, 0.0  ;;  %v505_v52 = vsub.f32 %v501_v50, %v503_v48 }
 0x560   :  { %v510_v53 = vadd.f32 1e-05, %v508_v51  ;;  %v507_v54 = vmax.f32 %v505_v52, 0.0 }
 0x562   :  { %1067 = vrsqrt.f32 %v510_v53  ;;  %v509_v55 = vadd.f32 1e-05, %v507_v54 }
 0x564   :  { %1069 = vrsqrt.f32 %v509_v55 }
 0x56c   :  { %v1068_v57 = vpop.eup %1067 }
 0x56d   :  { %v514_v59 = vmul.f32 %v1068_v57, %v28_v56 }
 0x56e   :  { %v1070_v60 = vpop.eup %1069 }
 0x56f   :  { %v516_v61 = vmul.f32 %v514_v59, %v492_v43  ;;  %v513_v62 = vmul.f32 %v1070_v60, %v27_v58 }
 0x571   :  { %521 = vrot.lane.b32.xlu1 %v516_v61, %s1083_s23  ;;  %v515_v63 = vmul.f32 %v513_v62, %v491_v42 }
 0x573   :  { %519 = vrot.lane.b32.xlu0 %v515_v63, %s1083_s23 }
 0x575   :  { %529 = vperm.xlu1 %930, %v513_v62  }
 0x577   :  { %534 = vperm.xlu0 %932, %v514_v59  }
 0x579   :  { %933 = vset.pattern.permute.xlu1 %v1082_v17 }
 0x57b   :  { %1009 = vset.pattern.permute.xlu0 %v1082_v17 }
 0x5e3   :  { %v522_v4 = vpop.permute.xlu1 %521 }
 0x5e4   :  { %v526_v3 = vsub.f32 %v28_v56, %v522_v4 }
 0x5e5   :  { %v520_v1 = vpop.permute.xlu0 %519 }
 0x5e6   :  { %v525_v2 = vsub.f32 %v27_v58, %v520_v1 }
 0x5e8   :  { %541 = vperm.xlu1 %933, %v525_v2  }
 0x5ec   :  { %546 = vperm.xlu1 %933, %v526_v3  }
 0x5f4   :  { %v530_v7 = vpop.permute.xlu1 %529 }
 0x5f5   :  { %v537_v17 = vmul.f32 %v530_v7, %v477_v30 }
 0x5f6   :  { %v535_v8 = vpop.permute.xlu0 %534 }
 0x5f7   :  { %v538_v11 = vmul.f32 %v535_v8, %v480_v33 }
 0x667   :  { %v542_v9 = vpop.permute.xlu1 %541 }
 0x668   :  { %v549_v10 = vadd.f32 %v542_v9, %v537_v17 }
 0x66a   :  { %v551_v13 = vmul.f32 0.2, %v549_v10 }
 0x66b   :  { %v547_v12 = vpop.permute.xlu1 %546 }
 0x66c   :  { %v550_v14 = vadd.f32 %v547_v12, %v538_v11  ;;  %v553_v16 = vmax.f32 %v549_v10, %v551_v13 }
 0x66e   :  { %v552_v15 = vmul.f32 0.2, %v550_v14 }
 0x670   :  { %v554_v18 = vmax.f32 %v550_v14, %v552_v15 }
 0x672   :  { %v555_v19 = vpack.c.bf16 %v554_v18, %v553_v16 }
 0x674   :  { %904 = vmatmul.mubr.msk.bf16.vlgmr.msra.gmra.mrb[4].mxu0 %vm484_vm2, %v555_v19 }
 0x675   :  { %766 = vmatprep.mubr.bf16.mxu0 %v1064_v25 }
 0x747   :  { %v609_v0 = vpop.f32.mrb[4].mxu0 }
 0x748   :  { %v905_v20 = vpop.f32.mrb[5].mxu0 }
 0x749   :  { %v612_v21 = vpop.f32.mrb[6].mxu0 }
 0x74a   :  { %v906_v22 = vpop.f32.mrb[7].mxu0  ;;  %v939_v23 = vpack.i.bf16 %v612_v21, %v609_v0  ;;  %v708_v24 = vpack.c.bf16 %v612_v21, %v609_v0 }
 0x74b   :  { %v1062_v22 = vld [vmem:[%s1303_s1 + $0x18] ss:$8 sps:$4 sm:$0xff]  }
 0x74c   :  { %940 = vrot.lane.b32.xlu1 %v939_v23, %s1087_s4  ;;  %935 = vrot.lane.b32.xlu0 %v939_v23, %s1088_s22 }
 0x750   :  { %950 = vrot.lane.b32.xlu1 %v939_v23, %s1089_s24  ;;  %945 = vrot.lane.b32.xlu0 %v939_v23, %s1090_s25 }
 0x754   :  { %960 = vrot.lane.b32.xlu1 %v939_v23, %s1091_s26  ;;  %955 = vrot.lane.b32.xlu0 %v939_v23, %s1092_s27 }
 0x758   :  { %970 = vrot.lane.b32.xlu1 %v939_v23, %s1093_s28  ;;  %965 = vrot.lane.b32.xlu0 %v939_v23, %s1094_s29 }
 0x75c   :  { %980 = vrot.lane.b32.xlu1 %v939_v23, %s1095_s30  ;;  %975 = vrot.lane.b32.xlu0 %v939_v23, %s1096_s6 }
 0x760   :  { %990 = vrot.lane.b32.xlu1 %v939_v23, %s1097_s7  ;;  %985 = vrot.lane.b32.xlu0 %v939_v23, %s1098_s8 }
 0x764   :  { %1000 = vrot.lane.b32.xlu1 %v939_v23, %s1099_s11  ;;  %995 = vrot.lane.b32.xlu0 %v939_v23, %s1100_s12 }
 0x768   :  { %1005 = vrot.lane.b32.xlu0 %v939_v23, %s1101_s3 }
 0x7be   :  { %v941_v26 = vpop.permute.xlu1 %940  ;;  %v936_v27 = vpop.permute.xlu0 %935 }
 0x7bf   :  { %v943_v28 = vunpack.i.h.bf16 %v941_v26  ;;  %v942_v29 = vunpack.i.l.bf16 %v941_v26  ;;  %v938_v30 = vunpack.i.h.bf16 %v936_v27  ;;  %v937_v31 = vunpack.i.l.bf16 %v936_v27 }
 0x7c1   :  { %v716_v32 = vpack.c.bf16 %v938_v30, %v937_v31  ;;  %v717_v33 = vpack.c.bf16 %v943_v28, %v942_v29 }
 0x7c2   :  { %v951_v34 = vpop.permute.xlu1 %950  ;;  %v946_v35 = vpop.permute.xlu0 %945 }
 0x7c3   :  { %v953_v36 = vunpack.i.h.bf16 %v951_v34  ;;  %v952_v37 = vunpack.i.l.bf16 %v951_v34  ;;  %v948_v38 = vunpack.i.h.bf16 %v946_v35  ;;  %v947_v39 = vunpack.i.l.bf16 %v946_v35  ;;  %851 = vmatprep.subr.bf16.mxu0 %v716_v32 }
 0x7c4   :  { %852 = vmatpush3.bf16.msra.mxu0 %v708_v24 }
 0x7c5   :  { %v709_v40 = vpack.c.bf16 %v948_v38, %v947_v39  ;;  %853 = vmatprep.subr.bf16.mxu0 %v717_v33  ;;  %v718_v41 = vpack.c.bf16 %v953_v36, %v952_v37 }
 0x7c6   :  { %v961_v42 = vpop.permute.xlu1 %960  ;;  %v956_v43 = vpop.permute.xlu0 %955 }
 0x7c7   :  { %v963_v44 = vunpack.i.h.bf16 %v961_v42  ;;  %v962_v45 = vunpack.i.l.bf16 %v961_v42  ;;  %v958_v46 = vunpack.i.h.bf16 %v956_v43  ;;  %v957_v47 = vunpack.i.l.bf16 %v956_v43 }
 0x7c8   :  { %854 = vmatpush3.bf16.msra.mxu0 %v709_v40 }
 0x7c9   :  { %v710_v48 = vpack.c.bf16 %v958_v46, %v957_v47  ;;  %855 = vmatprep.subr.bf16.mxu0 %v718_v41  ;;  %v719_v49 = vpack.c.bf16 %v963_v44, %v962_v45 }
 0x7ca   :  { %v971_v50 = vpop.permute.xlu1 %970  ;;  %v966_v51 = vpop.permute.xlu0 %965 }
 0x7cb   :  { %v973_v52 = vunpack.i.h.bf16 %v971_v50  ;;  %v972_v53 = vunpack.i.l.bf16 %v971_v50  ;;  %v968_v54 = vunpack.i.h.bf16 %v966_v51  ;;  %v967_v55 = vunpack.i.l.bf16 %v966_v51 }
 0x7cc   :  { %856 = vmatpush3.bf16.msra.mxu0 %v710_v48 }
 0x7cd   :  { %v711_v56 = vpack.c.bf16 %v968_v54, %v967_v55  ;;  %857 = vmatprep.subr.bf16.mxu0 %v719_v49  ;;  %v720_v57 = vpack.c.bf16 %v973_v52, %v972_v53 }
 0x7ce   :  { %v981_v58 = vpop.permute.xlu1 %980  ;;  %v976_v59 = vpop.permute.xlu0 %975 }
 0x7cf   :  { %v983_v60 = vunpack.i.h.bf16 %v981_v58  ;;  %v982_v61 = vunpack.i.l.bf16 %v981_v58  ;;  %v978_v62 = vunpack.i.h.bf16 %v976_v59  ;;  %v977_v63 = vunpack.i.l.bf16 %v976_v59 }
 0x7d0   :  { %858 = vmatpush3.bf16.msra.mxu0 %v711_v56 }
 0x7d1   :  { %v712_v1 = vpack.c.bf16 %v978_v62, %v977_v63  ;;  %859 = vmatprep.subr.bf16.mxu0 %v720_v57  ;;  %v721_v2 = vpack.c.bf16 %v983_v60, %v982_v61 }
 0x7d2   :  { %v991_v4 = vpop.permute.xlu1 %990  ;;  %v986_v3 = vpop.permute.xlu0 %985 }
 0x7d3   :  { %v993_v5 = vunpack.i.h.bf16 %v991_v4  ;;  %v992_v6 = vunpack.i.l.bf16 %v991_v4  ;;  %v988_v7 = vunpack.i.h.bf16 %v986_v3  ;;  %v987_v17 = vunpack.i.l.bf16 %v986_v3 }
 0x7d4   :  { %860 = vmatpush3.bf16.msra.mxu0 %v712_v1 }
 0x7d5   :  { %v713_v8 = vpack.c.bf16 %v988_v7, %v987_v17  ;;  %861 = vmatprep.subr.bf16.mxu0 %v721_v2  ;;  %v722_v9 = vpack.c.bf16 %v993_v5, %v992_v6 }
 0x7d6   :  { %v1001_v10 = vpop.permute.xlu1 %1000  ;;  %v996_v11 = vpop.permute.xlu0 %995 }
 0x7d7   :  { %v1003_v12 = vunpack.i.h.bf16 %v1001_v10  ;;  %v1002_v13 = vunpack.i.l.bf16 %v1001_v10  ;;  %v998_v14 = vunpack.i.h.bf16 %v996_v11  ;;  %v997_v15 = vunpack.i.l.bf16 %v996_v11 }
 0x7d8   :  { %862 = vmatpush3.bf16.msra.mxu0 %v713_v8 }
 0x7d9   :  { %v714_v16 = vpack.c.bf16 %v998_v14, %v997_v15  ;;  %863 = vmatprep.subr.bf16.mxu0 %v722_v9  ;;  %v723_v19 = vpack.c.bf16 %v1003_v12, %v1002_v13 }
 0x7da   :  { %v1006_v18 = vpop.permute.xlu0 %1005 }
 0x7db   :  { %v1008_v0 = vunpack.i.h.bf16 %v1006_v18  ;;  %v1007_v20 = vunpack.i.l.bf16 %v1006_v18 }
 0x7dc   :  { %864 = vmatpush3.bf16.msra.mxu0 %v714_v16 }
 0x7dd   :  { %v715_v21 = vpack.c.bf16 %v1008_v0, %v1007_v20  ;;  %865 = vmatprep.subr.bf16.mxu0 %v723_v19 }
 0x7e0   :  { %866 = vmatpush3.bf16.msra.mxu0 %v715_v21 }
 0x7e3   :  { %767 = vmatmul.mubr.bf16.vlgmr.msra.gmra.mrb[8].mxu0 %v1062_v22 }
 0x8b6   :  { %v867_v23 = vpop.f32.mrb[8].mxu0 }
 0x8b7   :  { %v868_v24 = vpop.f32.mrb[9].mxu0 }
 0x8b8   :  { %v869_v25 = vadd.f32 %v868_v24, %v867_v23  ;;  %v870_v26 = vpop.f32.mrb[10].mxu0 }
 0x8b9   :  { %v871_v27 = vpop.f32.mrb[11].mxu0 }
 0x8ba   :  { %v835_v28 = vmul.f32 -1.442695, %v869_v25  ;;  %v872_v29 = vadd.f32 %v871_v27, %v870_v26 }
 0x8bc   :  { %1071 = vpow2.f32 %v835_v28  ;;  %v836_v30 = vmul.f32 -1.442695, %v872_v29 }
 0x8be   :  { %1073 = vpow2.f32 %v836_v30 }
 0x8c6   :  { %v1072_v31 = vpop.eup %1071 }
 0x8c7   :  { %v781_v32 = vadd.f32 1.0, %v1072_v31 }
 0x8c8   :  { %v1074_v33 = vpop.eup %1073 }
 0x8c9   :  { %1075 = vrcp.f32 %v781_v32  ;;  %v782_v34 = vadd.f32 1.0, %v1074_v33 }
 0x8cb   :  { %1077 = vrcp.f32 %v782_v34 }
 0x8d3   :  { %v1076_v35 = vpop.eup %1075 }
 0x8d4   :  { %788 = vst.msk [vmem:[%s1307_s5] sm:$0xff] %vm787_vm3, %v1076_v35 }
 0x8d5   :  { %v1078_v36 = vpop.eup %1077 }
 0x8d6   :  { %790 = vst.msk [vmem:[%s1307_s5 + $0x8] sm:$0x3] %vm789_vm4, %v1078_v36 }

</bundles_post_ra>
